<compile_context>
chip_gen: v5e
topology: v5e:2x2
jax: 0.10.0
libtpu: 0.0.40
codegen_flags: <defaults>
</compile_context>

<pallas_src>
import functools

import jax
import jax.numpy as jnp
from jax.experimental import pallas as pl
from jax.experimental.pallas import tpu as pltpu


def _round_up(a, b):
    return (a + b - 1) // b * b


def _pad2(a, rows, cols):
    pr, pc = rows - a.shape[0], cols - a.shape[1]
    if pr or pc:
        a = jnp.pad(a, ((0, pr), (0, pc)))
    return a


def _single_k_kernel(x_ref, w_ref, b_ref, o_ref):
    """Full-K contraction in one shot: out = x @ w + bias (f32 accumulation)."""
    acc = jax.lax.dot_general(
        x_ref[...], w_ref[...],
        dimension_numbers=(((1,), (0,)), ((), ())),
        preferred_element_type=jnp.float32,
    )
    o_ref[...] = (acc + b_ref[...].astype(jnp.float32)).astype(o_ref.dtype)


def _multi_k_kernel(x_ref, w_ref, b_ref, o_ref, acc_ref):
    """K-tiled contraction with f32 VMEM accumulator; bias folded into init."""
    k = pl.program_id(2)

    @pl.when(k == 0)
    def _():
        acc_ref[...] = jnp.broadcast_to(
            b_ref[...].astype(jnp.float32), acc_ref.shape)

    acc_ref[...] += jax.lax.dot_general(
        x_ref[...], w_ref[...],
        dimension_numbers=(((1,), (0,)), ((), ())),
        preferred_element_type=jnp.float32,
    )

    @pl.when(k == pl.num_programs(2) - 1)
    def _():
        o_ref[...] = acc_ref[...].astype(o_ref.dtype)


def positive_linear(x, log_weight, bias=None, *,
                    compute_dtype=jnp.bfloat16,
                    tm=512, tn=512, tk=None,
                    weight_buffers=2,
                    vmem_budget=40 * 1024 * 1024):
    """Pallas TPU implementation of PositiveLinear.forward.

    x:          (B, in_features)            float32
    log_weight: (out_features, in_features) float32 (PyTorch nn.Linear layout)
    bias:       (1, out_features) / (out_features,) / None
    compute_dtype: MXU operand dtype. Default bf16 (f32 exp, f32 accumulation);
                   pass None for full-f32 operands.
    returns:    (B, out_features) in x.dtype
    """
    B, K = x.shape
    N, K2 = log_weight.shape
    assert K == K2, (K, K2)
    out_dtype = x.dtype
    in_bytes = jnp.dtype(compute_dtype if compute_dtype is not None
                         else out_dtype).itemsize
    out_bytes = jnp.dtype(out_dtype).itemsize

    # ---- tile selection -----------------------------------------------------
    tm = min(tm, _round_up(B, 8))           # minimal M padding for awkward B
    tn = min(tn, _round_up(N, 128))         # lane-dense output tiles
    Mp, Np = _round_up(B, tm), _round_up(N, tn)
    gm, gn = Mp // tm, Np // tn

    # Megacore (v7x): make sure the parallel axes have >= 2 total blocks.
    if gm == 1 and gn == 1:
        if N >= 256:
            tn = _round_up(pl.cdiv(N, 2), 128)
            Np = _round_up(N, tn)
            gn = Np // tn
        elif B >= 16:
            tm = _round_up(pl.cdiv(B, 2), 8)
            Mp = _round_up(B, tm)
            gm = Mp // tm

    # Prefer full K (gk == 1); shrink only if the VMEM footprint says so.
    if tk is None:
        tk = _round_up(K, 128)
    else:
        tk = min(_round_up(tk, 128), _round_up(K, 128))

    def _footprint(tk_, gk_):
        f = 2 * (tm * tk_ + tk_ * tn) * in_bytes   # double-buffered x & w tiles
        f += 2 * tm * tn * out_bytes               # double-buffered output tile
        f += 2 * tn * 4                            # bias tile
        if gk_ > 1:
            f += tm * tn * 4                       # f32 accumulator scratch
        return f

    while True:
        Kp = _round_up(K, tk)
        gk = Kp // tk
        if _footprint(tk, gk) <= vmem_budget or tk <= 128:
            break
        tk = max(128, _round_up(pl.cdiv(tk, 2), 128))

    # Keep the scoped-VMEM request <= 48 MiB (safe under v7x's 64 MiB/TC).
    vmem_limit = int(min(48 * 1024 * 1024,
                         max(32 * 1024 * 1024, _footprint(tk, gk) * 5 // 4)))

    # ---- one fused wrapper pass: exp + transpose + cast + pad ---------------
    # exp is computed exactly ONCE per weight element (f32), outside the kernel.
    w = jnp.exp(log_weight.astype(jnp.float32)).T          # (K, N)
    xc = x
    if compute_dtype is not None:
        w = w.astype(compute_dtype)
        xc = x.astype(compute_dtype)
    # Pad AFTER exp/cast: padded weight rows are 0 and padded x K-columns are 0,
    # so the padded region contributes exactly zero to the contraction.
    x_p = _pad2(xc, Mp, Kp)
    w_p = _pad2(w, Kp, Np)
    if bias is None:
        b_p = jnp.zeros((1, Np), dtype=jnp.float32)
    else:
        b_p = _pad2(jnp.asarray(bias, dtype=jnp.float32).reshape(1, N), 1, Np)

    cost = pl.CostEstimate(
        flops=2 * Mp * Np * Kp,
        transcendentals=0,                                   # exp hoisted out
        bytes_accessed=(Mp * Kp * in_bytes * gn + Kp * Np * in_bytes * gm
                        + Mp * Np * out_bytes + Np * 4),
    )

    def _w_spec(index_map):
        # Optional deeper prefetch for weight-DMA-bound (small-M) cases.
        if weight_buffers != 2:
            return pl.BlockSpec((tk, tn), index_map,
                                pipeline_mode=pl.Buffered(weight_buffers))
        return pl.BlockSpec((tk, tn), index_map)

    if gk == 1:
        kernel = _single_k_kernel
        grid = (gm, gn)
        in_specs = [
            pl.BlockSpec((tm, tk), lambda i, j: (i, 0)),      # x tile
            _w_spec(lambda i, j: (0, j)),                     # exp-weight tile
            pl.BlockSpec((1, tn), lambda i, j: (0, j)),       # bias tile
        ]
        out_specs = pl.BlockSpec((tm, tn), lambda i, j: (i, j))
        scratch = []
        dims = ("parallel", "parallel")
    else:
        kernel = _multi_k_kernel
        grid = (gm, gn, gk)
        in_specs = [
            pl.BlockSpec((tm, tk), lambda i, j, k: (i, k)),   # x tile
            _w_spec(lambda i, j, k: (k, j)),                  # exp-weight tile
            pl.BlockSpec((1, tn), lambda i, j, k: (0, j)),    # bias (resident)
        ]
        out_specs = pl.BlockSpec((tm, tn), lambda i, j, k: (i, j))
        scratch = [pltpu.VMEM((tm, tn), jnp.float32)]
        dims = ("parallel", "parallel", "arbitrary")

    out_p = pl.pallas_call(
        kernel,
        out_shape=jax.ShapeDtypeStruct((Mp, Np), out_dtype),
        grid_spec=pltpu.PrefetchScalarGridSpec(
            num_scalar_prefetch=0,
            grid=grid,
            in_specs=in_specs,
            out_specs=out_specs,
            scratch_shapes=scratch,
        ),
        compiler_params=pltpu.CompilerParams(
            dimension_semantics=dims,
            vmem_limit_bytes=vmem_limit,
        ),
        cost_estimate=cost,
    )(x_p, w_p, b_p)

    return out_p[:B, :N]


if __name__ == "__main__":
    key = jax.random.PRNGKey(0)
    k_x, k_b, k_x2, k_w2, k_b2 = jax.random.split(key, 5)
    hi = jax.lax.Precision.HIGHEST

    # ---- Small shapes matching the module's toy config ----------------------
    batch, in_features, out_features = 8, 32, 16
    x = jax.random.normal(k_x, (batch, in_features), dtype=jnp.float32)
    # reset_parameters(): log_weight = 0.0 -> effective weight = 1.0
    log_weight = jnp.zeros((out_features, in_features), dtype=jnp.float32)
    bias = 0.1 * jax.random.normal(k_b, (1, out_features), dtype=jnp.float32)

    ref = jax.lax.dot_general(x, jnp.exp(log_weight),
                              dimension_numbers=(((1,), (1,)), ((), ())),
                              precision=hi) + bias

    # f32-operand path: tight tolerance.
    out_f32 = jax.block_until_ready(
        positive_linear(x, log_weight, bias, compute_dtype=None))
    assert out_f32.shape == (batch, out_features)
    assert jnp.allclose(out_f32, ref, atol=1e-4, rtol=1e-4)

    # Default bf16 MXU path (f32 exp + f32 accumulation).
    out_bf16 = jax.block_until_ready(positive_linear(x, log_weight, bias))
    rel = jnp.max(jnp.abs(out_bf16 - ref)) / (jnp.max(jnp.abs(ref)) + 1e-6)
    assert rel < 3e-2

    # No-bias path.
    ref_nb = jax.lax.dot_general(x, jnp.exp(log_weight),
                                 dimension_numbers=(((1,), (1,)), ((), ())),
                                 precision=hi)
    out_nb = jax.block_until_ready(
        positive_linear(x, log_weight, None, compute_dtype=None))
    assert jnp.allclose(out_nb, ref_nb, atol=1e-4, rtol=1e-4)

    # ---- Larger shape: multi-tile N (megacore split) + full-K single shot ---
    M2, K2, N2 = 64, 1024, 256
    x2 = jax.random.normal(k_x2, (M2, K2), dtype=jnp.float32)
    lw2 = 0.05 * jax.random.normal(k_w2, (N2, K2), dtype=jnp.float32)
    b2 = 0.1 * jax.random.normal(k_b2, (1, N2), dtype=jnp.float32)

    ref2 = jax.lax.dot_general(x2, jnp.exp(lw2),
                               dimension_numbers=(((1,), (1,)), ((), ())),
                               precision=hi) + b2

    out2_f32 = jax.block_until_ready(
        positive_linear(x2, lw2, b2, compute_dtype=None))
    assert jnp.allclose(out2_f32, ref2, atol=1e-2, rtol=1e-3)

    out2_bf16 = jax.block_until_ready(positive_linear(x2, lw2, b2))
    rel2 = jnp.max(jnp.abs(out2_bf16 - ref2)) / (jnp.max(jnp.abs(ref2)) + 1e-6)
    assert rel2 < 3e-2

    # Explicit tk forces gk > 1 -> exercises the multi-K accumulator kernel
    # (bias folded into the accumulator init at k == 0).
    out2_mk = jax.block_until_ready(
        positive_linear(x2, lw2, b2, compute_dtype=None, tk=256))
    assert jnp.allclose(out2_mk, ref2, atol=1e-2, rtol=1e-3)

    print("KERNEL_OK")
</pallas_src>

<mosaic_0001>
module attributes {stable_mosaic.version = 11 : i64} {
  func.func @_single_k_kernel(%arg0: i32, %arg1: i32, %arg2: memref<8x128xf32, #tpu.memory_space<vmem>>, %arg3: memref<128x128xf32, #tpu.memory_space<vmem>>, %arg4: memref<1x128xf32, #tpu.memory_space<vmem>>, %arg5: memref<8x128xf32, #tpu.memory_space<vmem>>) attributes {dimension_semantics = [#tpu.dimension_semantics<parallel>, #tpu.dimension_semantics<parallel>], iteration_bounds = array<i64: 1, 1>, scalar_prefetch = 0 : i64, scratch_operands = 0 : i64, tpu.core_type = #tpu.core_type<tc>, window_params = [{transform_indices = @transform_0, window_bounds = array<i64: 8, 128>}, {transform_indices = @transform_1, window_bounds = array<i64: 128, 128>}, {transform_indices = @transform_2, window_bounds = array<i64: 1, 128>}, {transform_indices = @transform_3, window_bounds = array<i64: 8, 128>}]} {
    %c0 = arith.constant 0 : index
    %c0_0 = arith.constant 0 : index
    %0 = vector.load %arg2[%c0, %c0_0] : memref<8x128xf32, #tpu.memory_space<vmem>>, vector<8x128xf32>
    %c0_1 = arith.constant 0 : index
    %c0_2 = arith.constant 0 : index
    %1 = vector.load %arg3[%c0_1, %c0_2] : memref<128x128xf32, #tpu.memory_space<vmem>>, vector<128x128xf32>
    %cst = arith.constant dense<0.000000e+00> : vector<8x128xf32>
    %2 = tpu.matmul %0, %1, %cst {dimension_numbers = #tpu.dot_dimension_numbers<[1], [0], [0], [1], [0, 0, 1, 1], [], []>} : vector<8x128xf32>, vector<128x128xf32>, vector<8x128xf32> -> vector<8x128xf32>
    %c0_3 = arith.constant 0 : index
    %c0_4 = arith.constant 0 : index
    %3 = vector.load %arg4[%c0_3, %c0_4] : memref<1x128xf32, #tpu.memory_space<vmem>>, vector<1x128xf32>
    %4 = vector.broadcast %3 : vector<1x128xf32> to vector<8x128xf32>
    %5 = arith.addf %2, %4 : vector<8x128xf32>
    %c0_5 = arith.constant 0 : index
    %c0_6 = arith.constant 0 : index
    %6 = vector.load %arg5[%c0_5, %c0_6] : memref<8x128xf32, #tpu.memory_space<vmem>>, vector<8x128xf32>
    tpu.vector_store %arg5[%c0_5, %c0_6], %5 {strides = array<i32>} : memref<8x128xf32, #tpu.memory_space<vmem>>, vector<8x128xf32>,
    return
  }
  func.func @transform_0(%arg0: i32, %arg1: i32) -> (i32, i32) {
    %c0_i32 = arith.constant 0 : i32
    %c0_i32_0 = arith.constant 0 : i32
    return %arg0, %c0_i32 : i32, i32
  }
  func.func @transform_1(%arg0: i32, %arg1: i32) -> (i32, i32) {
    %c0_i32 = arith.constant 0 : i32
    %c0_i32_0 = arith.constant 0 : i32
    return %c0_i32, %arg1 : i32, i32
  }
  func.func @transform_2(%arg0: i32, %arg1: i32) -> (i32, i32) {
    %c0_i32 = arith.constant 0 : i32
    %c0_i32_0 = arith.constant 0 : i32
    return %c0_i32, %arg1 : i32, i32
  }
  func.func @transform_3(%arg0: i32, %arg1: i32) -> (i32, i32) {
    %c0_i32 = arith.constant 0 : i32
    return %arg0, %arg1 : i32, i32
  }
}

</mosaic_0001>

<bundles_post_ra>
// kernel: tpu_custom_call.1
= control target key start
LH: loop header
LB: loop body
LE: loop exit
PB: predicated region body
PF: predicated region fallthrough
CT: control target
= control target key end

     0   :  { %8 = vsyncpa [#allocation3], 0  ;;  %s226_s0 = inlined_call_operand.hbm [shape: f32[8,128], index: 0, kind: input, shape index: {}]   ;;  %s227_s1 = inlined_call_operand.hbm [shape: f32[128,128], index: 1, kind: input, shape index: {}]   ;;  %s228_s2 = inlined_call_operand.vmem [shape: f32[1,128], index: 2, kind: input, shape index: {}]   ;;  %s229_s3 = inlined_call_operand.hbm [shape: f32[8,128], index: 3, kind: output, shape index: {}]  }
   0x1   :  { %9 = vsyncpa [#allocation6], 0 }
   0x2   :  { %10 = vsyncpa [#allocation4], 0  ;;  %s16_s14 = sshll.u32 %s226_s0, 4  ;;  %s189_s15 = smov [#allocation2]   ;;  %s17_s14 = int_to_ptr.hbm [resolvable:$true] %s16_s14 }
   0x3   :  { %s18_s16 = sshll.u32 %s189_s15, 4  ;;  %s26_s19 = sshll.u32 %s227_s1, 4  ;;  %s19_s16 = int_to_ptr.vmem [resolvable:$true] %s18_s16  ;;  %s27_s19 = int_to_ptr.hbm [resolvable:$true] %s26_s19 }
   0x4   :  { %21 = dma.hbm_to_vmem [thread:$0]  %s17_s14, 128, %s19_s16, [#allocation3]  }
   0x5   :  { %s190_s20 = smov [#allocation5]   ;;  %s191_s22 = smov 128  }
   0x6   :  { %s28_s21 = sshll.u32 %s190_s20, 4  ;;  %s192_s23 = smov 8   ;;  %s29_s21 = int_to_ptr.vmem [resolvable:$true] %s28_s21 }
   0x7   :  { %34 = dma.hbm_to_vmem [thread:$0]  %s27_s19, 2048, %s29_s21, [#allocation6], %s191_s22, %s191_s22, %s192_s23  }
   0x8   :  { %183 = dma.done.wait [#allocation3], 128  }
   0x9   :  { %184 = vsyncadd [#allocation3], 4294967168 }
   0xa   :  { %185 = dma.done.wait [#allocation6], 2048  }
   0xb   :  { %186 = vsyncadd [#allocation6], 4294965248  ;;  %v61_v0 = vld [vmem:[#allocation5 + $0x78] sm:$0xff]  ;;  %v60_v1 = vld [vmem:[#allocation5 + $0x70] sm:$0xff]  ;;  %s193_s24 = smov [#allocation7]   ;;  %s94_s28 = sshll.u32 %s229_s3, 4  ;;  %s95_s28 = int_to_ptr.hbm [resolvable:$true] %s94_s28 }
   0xc   :  { %66 = vmatpush.msra.mxu0 %v61_v0  ;;  %v59_v2 = vld [vmem:[#allocation5 + $0x68] sm:$0xff]  ;;  %v58_v3 = vld [vmem:[#allocation5 + $0x60] sm:$0xff]  ;;  %v57_v4 = vld [vmem:[#allocation5 + $0x58] sm:$0xff]  ;;  %s92_s25 = sshll.u32 %s193_s24, 4  ;;  %s93_s25 = int_to_ptr.vmem [resolvable:$true] %s92_s25 }
   0xd   :  { %v56_v5 = vld [vmem:[#allocation5 + $0x50] sm:$0xff]  ;;  %v55_v6 = vld [vmem:[#allocation5 + $0x48] sm:$0xff]  ;;  %v54_v7 = vld [vmem:[#allocation5 + $0x40] sm:$0xff] }
   0xe   :  { %67 = vmatpush.msra.mxu0 %v60_v1  ;;  %v53_v8 = vld [vmem:[#allocation5 + $0x38] sm:$0xff]  ;;  %v52_v9 = vld [vmem:[#allocation5 + $0x30] sm:$0xff]  ;;  %v51_v10 = vld [vmem:[#allocation5 + $0x28] sm:$0xff] }
   0xf   :  { %v50_v11 = vld [vmem:[#allocation5 + $0x20] sm:$0xff]  ;;  %v49_v12 = vld [vmem:[#allocation5 + $0x18] sm:$0xff]  ;;  %v48_v13 = vld [vmem:[#allocation5 + $0x10] sm:$0xff] }
  0x10   :  { %68 = vmatpush.msra.mxu0 %v59_v2  ;;  %v47_v14 = vld [vmem:[#allocation5 + $0x8] sm:$0xff]  ;;  %v46_v15 = vld [vmem:[#allocation5] sm:$0xff]  ;;  %v45_v16 = vld [vmem:[#allocation2] sm:$0xff] }
  0x11   :  { %v110_v17 = vld [vmem:[%s228_s2] ss:$0 sm:$0xff] }
  0x12   :  { %69 = vmatpush.msra.mxu0 %v58_v3 }
  0x14   :  { %70 = vmatpush.msra.mxu0 %v57_v4 }
  0x16   :  { %71 = vmatpush.msra.mxu0 %v56_v5 }
  0x18   :  { %72 = vmatpush.msra.mxu0 %v55_v6 }
  0x1a   :  { %73 = vmatpush.msra.mxu0 %v54_v7 }
  0x1c   :  { %74 = vmatpush.msra.mxu0 %v53_v8 }
  0x1e   :  { %75 = vmatpush.msra.mxu0 %v52_v9 }
  0x20   :  { %76 = vmatpush.msra.mxu0 %v51_v10 }
  0x22   :  { %77 = vmatpush.msra.mxu0 %v50_v11 }
  0x24   :  { %78 = vmatpush.msra.mxu0 %v49_v12 }
  0x26   :  { %79 = vmatpush.msra.mxu0 %v48_v13 }
  0x28   :  { %80 = vmatpush.msra.mxu0 %v47_v14 }
  0x2a   :  { %81 = vmatpush.msra.mxu0 %v46_v15 }
  0x2b   :  { %82 = vmatmul.f32.vlgmr.msra.gmra.mxu0 %v45_v16 }
  0xa8   :  { %v83_v18 = vpop.f32.mrf.mxu0 }
  0xa9   :  { %v84_v19 = vadd.f32 %v110_v17, %v83_v18 }
  0xab   :  { %86 = vst [vmem:[#allocation7] sm:$0xff] %v84_v19 }
  0xac   :  { %97 = dma.vmem_to_hbm [thread:$0]  %s93_s25, 128, %s95_s28, [#allocation4]  }
  0xad   :  { %187 = dma.done.wait [#allocation4], 128  }
  0xae   :  { %188 = vsyncadd [#allocation4], 4294967168 }
  0xaf   :  { %102 = vsyncpa [#allocation3], 1 }
  0xb0   :  { %103 = vsyncpa [#allocation6], 1 }
  0xb1   :  { %104 = vsyncpa [#allocation4], 1 }

</bundles_post_ra>
